<compile_context>
chip_gen: v7x
topology: tpu7x:2x2x1
jax: 0.10.0
libtpu: 0.0.40
codegen_flags: <defaults>
</compile_context>

<pallas_src>
import functools

import jax
import jax.numpy as jnp
import numpy as np
from jax import lax
from jax.experimental import pallas as pl
from jax.experimental.pallas import tpu as pltpu


_VMEM = pl.BlockSpec(memory_space=pltpu.MemorySpace.VMEM)
# 64 MiB is safe on every generation (v7x has 64 MiB VMEM per TensorCore).  On
# v5e/v6e (128 MiB physical) this can be raised to ~100 MiB for bigger dst tiles.
_VMEM_LIMIT = 64 * 1024 * 1024
_HEAD_PAD = 8  # pad the heads axis to a full sublane group


# ---------------------------------------------------------------------------
# Pallas kernels
# ---------------------------------------------------------------------------
def gat_transform_kernel(x_ref, w_ref, asrc_ref, adst_ref,
                         h_ref, alpha_src_ref, alpha_dst_ref):
    """Per-layer node transform + grid-invariant attention coefficients.

    x:    [N, F_in]           w:     [F_in, H*C]
    asrc: [8, H*C]  (row h holds a_src[h] in cols h*C:(h+1)*C, zeros elsewhere)
    adst: [H*C, 8]  (col h holds a_dst[h] in rows h*C:(h+1)*C, zeros elsewhere)
    outputs:
    h:         [N, H*C] bf16        (resident source features for the attn kernel)
    alpha_src: [8, N]   f32  alpha_src[h, j] = <a_src[h], h_j[h]>
    alpha_dst: [N, 8]   f32  alpha_dst[i, h] = <a_dst[h], h_i[h]>
    """
    h32 = jnp.dot(x_ref[...].astype(jnp.bfloat16),
                  w_ref[...].astype(jnp.bfloat16),
                  preferred_element_type=jnp.float32)            # [N, H*C]
    h_bf = h32.astype(jnp.bfloat16)
    h_ref[...] = h_bf
    alpha_src_ref[...] = lax.dot_general(
        asrc_ref[...].astype(jnp.bfloat16), h_bf,
        (((1,), (1,)), ((), ())),
        preferred_element_type=jnp.float32)                      # [8, N]
    alpha_dst_ref[...] = jnp.dot(h_bf, adst_ref[...].astype(jnp.bfloat16),
                                 preferred_element_type=jnp.float32)  # [N, 8]


def gat_attn_kernel(h_ref, asrc_ref, adst_ref, bias_ref, adj_ref, out_ref,
                    *, heads, out_ch):
    """Masked multi-head attention + aggregation + ELU for one destination tile.

    h:    [N, H*C] bf16 (resident)    asrc: [8, N] f32 (resident)
    adst: [T, 8]   f32 (tiled)        bias: [1, H*C] (resident)
    adj:  [T, N]   int8 tile (adj[i,j]=1 iff edge j->i, incl. self loops)
    out:  [T, H*C] f32
    """
    t = out_ref.shape[0]
    c = out_ch

    adst = adst_ref[...]                                         # [T, 8]
    asrc = asrc_ref[...]                                         # [8, N]
    # Additive mask: 0 where edge exists, -1e30 elsewhere (adj is 0/1 int8).
    neg_mask = (adj_ref[...].astype(jnp.float32) - 1.0) * 1e30   # [T, N]

    # Stack all heads along the row axis -> ONE softmax pass over [H*T, N].
    e = jnp.concatenate(
        [adst[:, hh:hh + 1] + asrc[hh:hh + 1, :] for hh in range(heads)], axis=0)
    e = jnp.maximum(e, 0.2 * e)                                  # LeakyReLU(0.2)
    logits = e + jnp.concatenate([neg_mask] * heads, axis=0)     # [H*T, N]
    m = jnp.max(logits, axis=-1, keepdims=True)
    p = jnp.exp(logits - m)                                      # masked -> 0
    denom = jnp.maximum(jnp.sum(p, axis=-1, keepdims=True), 1e-20)
    attn = (p * pl.reciprocal(denom, approx=True)).astype(jnp.bfloat16)

    # Per-head aggregation: attn_h [T, N] @ h[:, head slab] [N, C]  (MXU, bf16 x bf16).
    outs = []
    for hh in range(heads):
        out_h = jnp.dot(attn[hh * t:(hh + 1) * t, :],
                        h_ref[:, hh * c:(hh + 1) * c],
                        preferred_element_type=jnp.float32)      # [T, C]
        outs.append(out_h)

    val = jnp.concatenate(outs, axis=-1) + bias_ref[...]         # [T, H*C]
    # ELU(1.0) fused; exp only evaluated on the clamped (<=0) branch to avoid inf.
    out_ref[...] = jnp.where(val > 0, val, jnp.exp(jnp.minimum(val, 0.0)) - 1.0)


def head_kernel(pool_ref, x_ref, w1_ref, b1_ref, w2_ref, b2_ref, out_ref):
    """global_mean_pool -> ReLU(lin1) -> lin2.

    pool: [G, N]  x: [N, H*C]  w1: [H*C, Hc]  b1: [1, Hc]  w2: [Hc, 1]  b2: [1, 1]
    """
    pooled = jnp.dot(pool_ref[...], x_ref[...], preferred_element_type=jnp.float32)
    h1 = jnp.dot(pooled, w1_ref[...], preferred_element_type=jnp.float32) + b1_ref[...]
    h1 = jnp.maximum(h1, 0.0)
    # TODO(synk): [G,1] is a 1-lane store; negligible here, pad lanes for production.
    out_ref[...] = jnp.dot(h1, w2_ref[...], preferred_element_type=jnp.float32) + b2_ref[...]


# ---------------------------------------------------------------------------
# Wrappers
# ---------------------------------------------------------------------------
def gat_transform(x, w, asrc_mat, adst_mat):
    n, _ = x.shape
    hc = w.shape[1]
    return pl.pallas_call(
        gat_transform_kernel,
        out_shape=(jax.ShapeDtypeStruct((n, hc), jnp.bfloat16),
                   jax.ShapeDtypeStruct((_HEAD_PAD, n), jnp.float32),
                   jax.ShapeDtypeStruct((n, _HEAD_PAD), jnp.float32)),
        in_specs=[_VMEM] * 4,
        out_specs=(_VMEM, _VMEM, _VMEM),
        compiler_params=pltpu.CompilerParams(vmem_limit_bytes=_VMEM_LIMIT),
    )(x, w, asrc_mat, adst_mat)


def gat_attention(h_bf, alpha_src, alpha_dst, bias, adj_i8, *, heads, out_ch, tile):
    n, hc = h_bf.shape
    assert n % tile == 0 and tile % 32 == 0 and n % 128 == 0
    num_tiles = n // tile
    kern = functools.partial(gat_attn_kernel, heads=heads, out_ch=out_ch)
    return pl.pallas_call(
        kern,
        out_shape=jax.ShapeDtypeStruct((n, hc), jnp.float32),
        grid_spec=pltpu.PrefetchScalarGridSpec(
            num_scalar_prefetch=0,
            grid=(num_tiles,),
            in_specs=[
                pl.BlockSpec((n, hc), lambda i: (0, 0)),          # h (bf16, resident)
                pl.BlockSpec((_HEAD_PAD, n), lambda i: (0, 0)),   # alpha_src (resident)
                pl.BlockSpec((tile, _HEAD_PAD), lambda i: (i, 0)),  # alpha_dst tile
                pl.BlockSpec((1, hc), lambda i: (0, 0)),          # bias (resident)
                pl.BlockSpec((tile, n), lambda i: (i, 0)),        # adj tile (int8)
            ],
            out_specs=pl.BlockSpec((tile, hc), lambda i: (i, 0)),
        ),
        compiler_params=pltpu.CompilerParams(
            dimension_semantics=("parallel",),      # no cross-tile state -> megacore OK
            vmem_limit_bytes=_VMEM_LIMIT,
        ),
    )(h_bf, alpha_src, alpha_dst, bias, adj_i8)


def gat_layer(x, w, asrc_mat, adst_mat, bias, adj_i8, *, heads, out_ch, tile):
    h_bf, a_src, a_dst = gat_transform(x, w, asrc_mat, adst_mat)
    return gat_attention(h_bf, a_src, a_dst, bias, adj_i8,
                         heads=heads, out_ch=out_ch, tile=tile)


def regression_head(pool, x, w1, b1, w2, b2):
    g = pool.shape[0]
    return pl.pallas_call(
        head_kernel,
        out_shape=jax.ShapeDtypeStruct((g, 1), jnp.float32),
        in_specs=[_VMEM] * 6,
        out_specs=_VMEM,
        compiler_params=pltpu.CompilerParams(vmem_limit_bytes=_VMEM_LIMIT),
    )(pool, x, w1, b1, w2, b2)


def gat_forward(params, x, adj_i8, pool, *, heads, hidden, tile):
    # conv1 + ELU  (F.dropout is identity in eval mode)
    h = gat_layer(x, *params["conv0"], adj_i8, heads=heads, out_ch=hidden, tile=tile)
    # TODO(synk): F.dropout omitted — module evaluated in inference mode (training=False).
    for layer_params in params["convs"]:
        h = gat_layer(h, *layer_params, adj_i8, heads=heads, out_ch=hidden, tile=tile)
    return regression_head(pool, h, params["w1"], params["b1"], params["w2"], params["b2"])


# ---------------------------------------------------------------------------
# Pure-JAX reference (same dense-adjacency / bf16-MXU math) for correctness check
# ---------------------------------------------------------------------------
def gat_layer_ref(x, w, asrc_mat, adst_mat, bias, adj, heads, out_ch):
    h32 = jnp.dot(x.astype(jnp.bfloat16), w.astype(jnp.bfloat16),
                  preferred_element_type=jnp.float32)
    h_bf = h32.astype(jnp.bfloat16)
    alpha_src = jnp.dot(asrc_mat.astype(jnp.bfloat16), h_bf.T,
                        preferred_element_type=jnp.float32)          # [8, N]
    alpha_dst = jnp.dot(h_bf, adst_mat.astype(jnp.bfloat16),
                        preferred_element_type=jnp.float32)          # [N, 8]
    neg_mask = (adj.astype(jnp.float32) - 1.0) * 1e30
    c = out_ch
    outs = []
    for hh in range(heads):
        e = alpha_dst[:, hh:hh + 1] + alpha_src[hh:hh + 1, :]
        e = jnp.maximum(e, 0.2 * e)
        logits = e + neg_mask
        m = jnp.max(logits, axis=-1, keepdims=True)
        p = jnp.exp(logits - m)
        attn = p / jnp.maximum(jnp.sum(p, axis=-1, keepdims=True), 1e-20)
        outs.append(jnp.dot(attn.astype(jnp.bfloat16), h_bf[:, hh * c:(hh + 1) * c],
                            preferred_element_type=jnp.float32))
    out = jnp.concatenate(outs, axis=-1) + bias
    return jnp.where(out > 0, out, jnp.exp(jnp.minimum(out, 0.0)) - 1.0)


def forward_ref(params, x, adj, pool, heads, hidden):
    hi = jax.lax.Precision.HIGHEST
    h = gat_layer_ref(x, *params["conv0"], adj, heads, hidden)
    for layer_params in params["convs"]:
        h = gat_layer_ref(h, *layer_params, adj, heads, hidden)
    pooled = jnp.dot(pool, h, precision=hi)
    h1 = jnp.maximum(jnp.dot(pooled, params["w1"], precision=hi) + params["b1"], 0.0)
    return jnp.dot(h1, params["w2"], precision=hi) + params["b2"]


# ---------------------------------------------------------------------------
# Parameter / input construction (deterministic, synthetic)
# ---------------------------------------------------------------------------
def init_params(key, dim_node, hidden, heads, num_layers):
    keys = iter(jax.random.split(key, 8 * num_layers + 8))

    def glorot(k, shape):
        fan_in = shape[0]
        return (jax.random.normal(k, shape, jnp.float32) / np.sqrt(fan_in)).astype(jnp.float32)

    hc = heads * hidden

    def conv_params(in_dim):
        w = glorot(next(keys), (in_dim, hc))
        a_s = np.asarray(glorot(next(keys), (heads, hidden)))
        a_d = np.asarray(glorot(next(keys), (heads, hidden)))
        # Expanded block matrices (heads axis padded to 8 sublanes) so the attention
        # coefficients come from two tiny matmuls in the transform kernel.
        asrc_mat = np.zeros((_HEAD_PAD, hc), np.float32)
        adst_mat = np.zeros((hc, _HEAD_PAD), np.float32)
        for h in range(heads):
            asrc_mat[h, h * hidden:(h + 1) * hidden] = a_s[h]
            adst_mat[h * hidden:(h + 1) * hidden, h] = a_d[h]
        b = jnp.full((1, hc), 0.01, jnp.float32)
        return (w, jnp.asarray(asrc_mat), jnp.asarray(adst_mat), b)

    params = {"conv0": conv_params(dim_node), "convs": []}
    for _ in range(num_layers - 1):
        params["convs"].append(conv_params(hc))
    params["w1"] = glorot(next(keys), (hc, hidden))
    params["b1"] = jnp.full((1, hidden), 0.01, jnp.float32)
    params["w2"] = glorot(next(keys), (hidden, 1))
    params["b2"] = jnp.full((1, 1), 0.01, jnp.float32)
    return params


def build_adjacency(edge_index, num_nodes, n_pad):
    adj = np.zeros((n_pad, n_pad), dtype=np.int8)        # int8: 4x less HBM/VMEM than f32
    src, dst = edge_index
    adj[dst, src] = 1
    idx = np.arange(num_nodes)
    adj[idx, idx] = 1                                    # GATConv add_self_loops=True
    return jnp.asarray(adj)                              # padded rows/cols stay all-zero


def build_pool(batch_idx, num_graphs, n_pad):
    batch_idx = np.asarray(batch_idx)
    counts = np.bincount(batch_idx, minlength=num_graphs).astype(np.float32)
    pool = np.zeros((num_graphs, n_pad), np.float32)
    pool[batch_idx, np.arange(batch_idx.shape[0])] = 1.0 / counts[batch_idx]
    return jnp.asarray(pool)                             # padded columns are zero


# ---------------------------------------------------------------------------
if __name__ == "__main__":
    # Small synthetic graph batch: 2 graphs x 100 nodes, ring edges in each graph.
    dim_node, hidden, heads, num_layers = 16, 8, 2, 3
    nodes_per_graph, num_graphs = 100, 2
    num_nodes = nodes_per_graph * num_graphs             # 200 real nodes
    TILE = 128                                           # dst tile (mult of 32 for int8 adj)
    n_pad = ((num_nodes + 127) // 128) * 128             # lane-dense source axis
    n_pad = ((n_pad + TILE - 1) // TILE) * TILE          # -> 256, grid = (2,)

    key = jax.random.PRNGKey(0)
    k_params, k_x = jax.random.split(key)

    params = init_params(k_params, dim_node, hidden, heads, num_layers)
    x = jax.random.normal(k_x, (num_nodes, dim_node), jnp.float32)
    x_pad = jnp.pad(x, ((0, n_pad - num_nodes), (0, 0)))

    src, dst = [], []
    for g in range(num_graphs):
        base = g * nodes_per_graph
        for i in range(nodes_per_graph):
            j = (i + 1) % nodes_per_graph
            src += [base + i, base + j]
            dst += [base + j, base + i]
    edge_index = np.stack([np.array(src), np.array(dst)])
    batch_idx = np.repeat(np.arange(num_graphs), nodes_per_graph)

    adj = build_adjacency(edge_index, num_nodes, n_pad)
    pool = build_pool(batch_idx, num_graphs, n_pad)

    out = gat_forward(params, x_pad, adj, pool, heads=heads, hidden=hidden, tile=TILE)
    out = jax.block_until_ready(out)

    ref = forward_ref(params, x_pad, adj, pool, heads, hidden)
    np.testing.assert_allclose(np.asarray(out), np.asarray(ref), rtol=2e-2, atol=2e-2)

    print("KERNEL_OK")
</pallas_src>

<mosaic_0001>
module attributes {stable_mosaic.version = 11 : i64} {
  func.func @gat_transform_kernel(%arg0: memref<256x16xf32, #tpu.memory_space<vmem>>, %arg1: memref<16x16xf32, #tpu.memory_space<vmem>>, %arg2: memref<8x16xf32, #tpu.memory_space<vmem>>, %arg3: memref<16x8xf32, #tpu.memory_space<vmem>>, %arg4: memref<256x16xbf16, #tpu.memory_space<vmem>>, %arg5: memref<8x256xf32, #tpu.memory_space<vmem>>, %arg6: memref<256x8xf32, #tpu.memory_space<vmem>>) attributes {dimension_semantics = [], scalar_prefetch = 0 : i64, scratch_operands = 0 : i64, tpu.core_type = #tpu.core_type<tc>} {
    %c0 = arith.constant 0 : index
    %c0_0 = arith.constant 0 : index
    %0 = vector.load %arg0[%c0, %c0_0] : memref<256x16xf32, #tpu.memory_space<vmem>>, vector<256x16xf32>
    %1 = arith.truncf %0 : vector<256x16xf32> to vector<256x16xbf16>
    %c0_1 = arith.constant 0 : index
    %c0_2 = arith.constant 0 : index
    %2 = vector.load %arg1[%c0_1, %c0_2] : memref<16x16xf32, #tpu.memory_space<vmem>>, vector<16x16xf32>
    %3 = arith.truncf %2 : vector<16x16xf32> to vector<16x16xbf16>
    %cst = arith.constant dense<0.000000e+00> : vector<256x16xf32>
    %4 = tpu.matmul %1, %3, %cst {dimension_numbers = #tpu.dot_dimension_numbers<[1], [0], [0], [1], [0, 0, 1, 1], [], []>} : vector<256x16xbf16>, vector<16x16xbf16>, vector<256x16xf32> -> vector<256x16xf32>
    %5 = arith.truncf %4 : vector<256x16xf32> to vector<256x16xbf16>
    %c0_3 = arith.constant 0 : index
    %c0_4 = arith.constant 0 : index
    %6 = vector.load %arg4[%c0_3, %c0_4] : memref<256x16xbf16, #tpu.memory_space<vmem>>, vector<256x16xbf16>
    tpu.vector_store %arg4[%c0_3, %c0_4], %5 {strides = array<i32>} : memref<256x16xbf16, #tpu.memory_space<vmem>>, vector<256x16xbf16>,
    %c0_5 = arith.constant 0 : index
    %c0_6 = arith.constant 0 : index
    %7 = vector.load %arg2[%c0_5, %c0_6] : memref<8x16xf32, #tpu.memory_space<vmem>>, vector<8x16xf32>
    %8 = arith.truncf %7 : vector<8x16xf32> to vector<8x16xbf16>
    %cst_7 = arith.constant dense<0.000000e+00> : vector<8x256xf32>
    %9 = tpu.matmul %8, %5, %cst_7 {dimension_numbers = #tpu.dot_dimension_numbers<[1], [1], [0], [0], [0, 0, 1, 0], [], []>} : vector<8x16xbf16>, vector<256x16xbf16>, vector<8x256xf32> -> vector<8x256xf32>
    %c0_8 = arith.constant 0 : index
    %c0_9 = arith.constant 0 : index
    %10 = vector.load %arg5[%c0_8, %c0_9] : memref<8x256xf32, #tpu.memory_space<vmem>>, vector<8x256xf32>
    tpu.vector_store %arg5[%c0_8, %c0_9], %9 {strides = array<i32>} : memref<8x256xf32, #tpu.memory_space<vmem>>, vector<8x256xf32>,
    %c0_10 = arith.constant 0 : index
    %c0_11 = arith.constant 0 : index
    %11 = vector.load %arg3[%c0_10, %c0_11] : memref<16x8xf32, #tpu.memory_space<vmem>>, vector<16x8xf32>
    %12 = arith.truncf %11 : vector<16x8xf32> to vector<16x8xbf16>
    %cst_12 = arith.constant dense<0.000000e+00> : vector<256x8xf32>
    %13 = tpu.matmul %5, %12, %cst_12 {dimension_numbers = #tpu.dot_dimension_numbers<[1], [0], [0], [1], [0, 0, 1, 1], [], []>} : vector<256x16xbf16>, vector<16x8xbf16>, vector<256x8xf32> -> vector<256x8xf32>
    %c0_13 = arith.constant 0 : index
    %c0_14 = arith.constant 0 : index
    %14 = vector.load %arg6[%c0_13, %c0_14] : memref<256x8xf32, #tpu.memory_space<vmem>>, vector<256x8xf32>
    tpu.vector_store %arg6[%c0_13, %c0_14], %13 {strides = array<i32>} : memref<256x8xf32, #tpu.memory_space<vmem>>, vector<256x8xf32>,
    return
  }
}

</mosaic_0001>

<bundles_post_ra>
// kernel: tpu_custom_call.1
= control target key start
LH: loop header
LB: loop body
LE: loop exit
PB: predicated region body
PF: predicated region fallthrough
CT: control target
= control target key end

     0   :  { %12 = vsyncpa [#allocation3], 0  ;;  %s1552_s0 = inlined_call_operand.hbm [shape: f32[256,16], index: 0, kind: input, shape index: {}]   ;;  %s1553_s1 = inlined_call_operand.hbm [shape: f32[16,16], index: 1, kind: input, shape index: {}]   ;;  %s1554_s2 = inlined_call_operand.hbm [shape: f32[8,16], index: 2, kind: input, shape index: {}]   ;;  %s1555_s3 = inlined_call_operand.hbm [shape: f32[16,8], index: 3, kind: input, shape index: {}]   ;;  %s1556_s4 = inlined_call_operand.hbm [shape: bf16[256,16], index: 4, kind: output, shape index: {0}]   ;;  %s1557_s5 = inlined_call_operand.hbm [shape: f32[8,256], index: 5, kind: output, shape index: {1}]   ;;  %s1558_s6 = inlined_call_operand.hbm [shape: f32[256,8], index: 6, kind: output, shape index: {2}]  }
   0x1   :  { %13 = vsyncpa [#allocation6], 0 }
   0x2   :  { %14 = vsyncpa [#allocation9], 0 }
   0x3   :  { %15 = vsyncpa [#allocation4], 0 }
   0x4   :  { %16 = vsyncpa [#allocation12], 0  ;;  %s1239_s21 = smov [#allocation5]   ;;  %s1240_s23 = smov [#allocation2]  }
   0x5   :  { %s34_s22 = sshll.u32 %s1239_s21, 4  ;;  %s22_s24 = sshll.u32 %s1240_s23, 4  ;;  %s35_s22 = int_to_ptr.vmem [resolvable:$true] %s34_s22  ;;  %s1285_s24 = int_to_ptr.vmem [resolvable:$true] %s22_s24 }
   0x6   :  { %s1075_s27 = scalar_lea.hbm %s1553_s1, 256 }
   0x7   :  { %p1076_p0 = scmp.ne.s32.totalorder %s1553_s1, %s1075_s27  ;;  %p1079_p1 = scmp.lt.u32.totalorder %s1075_s27, %s1553_s1 }
   0x9   :  { %p1081_p2 = pnand %p1079_p1, %p1076_p0 }
   0xb   :  { %1084 = shalt.err (!%p1081_p2)
}
   0xc   :  { %s1085_s8 = scalar_lea.vmem %s35_s22, 256  ;;  %p1090_p4 = scmp.lt.s32.totalorder %s35_s22, %s35_s22 }
   0xd   :  { %p1086_p3 = scmp.ne.s32.totalorder %s35_s22, %s1085_s8  ;;  %p1091_p5 = scmp.lt.s32.totalorder %s1085_s8, %s1085_s8 }
   0xf   :  { %p1092_p6 = por %p1091_p5, %p1090_p4 }
  0x11   :  { %p1093_p7 = pnand %p1092_p6, %p1086_p3 }
  0x13   :  { %1096 = shalt.err (!%p1093_p7)
}
  0x14   :  { %s1241_s9 = smov 128   ;;  %s1242_s10 = smov 8  }
  0x15   :  { %40 = dma.hbm_to_vmem [thread:$0]  %s1553_s1, 256, %s35_s22, [#allocation6], %s1241_s9, %s1241_s9, %s1242_s10  }
  0x16   :  { %s1097_s15 = scalar_lea.hbm %s1552_s0, 4096 }
  0x17   :  { %p1098_p8 = scmp.ne.s32.totalorder %s1552_s0, %s1097_s15  ;;  %p1101_p9 = scmp.lt.u32.totalorder %s1097_s15, %s1552_s0 }
  0x19   :  { %p1103_p10 = pnand %p1101_p9, %p1098_p8 }
  0x1b   :  { %1106 = shalt.err (!%p1103_p10)
}
  0x1c   :  { %s1107_s20 = scalar_lea.vmem %s1285_s24, 4096  ;;  %p1112_p12 = scmp.lt.s32.totalorder %s1285_s24, %s1285_s24 }
  0x1d   :  { %p1108_p11 = scmp.ne.s32.totalorder %s1285_s24, %s1107_s20  ;;  %p1113_p13 = scmp.lt.s32.totalorder %s1107_s20, %s1107_s20 }
  0x1f   :  { %p1114_p0 = por %p1113_p13, %p1112_p12 }
  0x21   :  { %p1115_p1 = pnand %p1114_p0, %p1108_p11 }
  0x23   :  { %1118 = shalt.err (!%p1115_p1)
}
  0x24   :  { %28 = dma.hbm_to_vmem [thread:$0]  %s1552_s0, 4096, %s1285_s24, [#allocation3], %s1241_s9, %s1241_s9, %s1242_s10  }
  0x25   :  { %s1243_s22 = smov [#allocation7]   ;;  %s1244_s25 = smov [#allocation8]  }
  0x26   :  { %s47_s23 = sshll.u32 %s1243_s22, 4  ;;  %s56_s26 = sshll.u32 %s1244_s25, 4  ;;  %s48_s23 = int_to_ptr.vmem [resolvable:$true] %s47_s23  ;;  %s1322_s26 = int_to_ptr.vmem [resolvable:$true] %s56_s26 }
  0x27   :  { %s1119_s29 = scalar_lea.hbm %s1554_s2, 128 }
  0x28   :  { %p1120_p2 = scmp.ne.s32.totalorder %s1554_s2, %s1119_s29  ;;  %p1123_p3 = scmp.lt.u32.totalorder %s1119_s29, %s1554_s2 }
  0x2a   :  { %p1125_p4 = pnand %p1123_p3, %p1120_p2 }
  0x2c   :  { %1128 = shalt.err (!%p1125_p4)
}
  0x2d   :  { %s1129_s0 = scalar_lea.vmem %s48_s23, 128  ;;  %p1134_p6 = scmp.lt.s32.totalorder %s48_s23, %s48_s23 }
  0x2e   :  { %p1130_p5 = scmp.ne.s32.totalorder %s48_s23, %s1129_s0  ;;  %p1135_p7 = scmp.lt.s32.totalorder %s1129_s0, %s1129_s0 }
  0x30   :  { %p1136_p8 = por %p1135_p7, %p1134_p6 }
  0x32   :  { %p1137_p9 = pnand %p1136_p8, %p1130_p5 }
  0x34   :  { %1140 = shalt.err (!%p1137_p9)
}
  0x35   :  { %50 = dma.hbm_to_vmem [thread:$0]  %s1554_s2, 128, %s48_s23, [#allocation6]  }
  0x36   :  { %s1141_s15 = scalar_lea.hbm %s1555_s3, 256 }
  0x37   :  { %p1142_p10 = scmp.ne.s32.totalorder %s1555_s3, %s1141_s15  ;;  %p1145_p11 = scmp.lt.u32.totalorder %s1141_s15, %s1555_s3 }
  0x39   :  { %p1147_p12 = pnand %p1145_p11, %p1142_p10 }
  0x3b   :  { %1150 = shalt.err (!%p1147_p12)
}
  0x3c   :  { %s1151_s20 = scalar_lea.vmem %s1322_s26, 256  ;;  %p1156_p0 = scmp.lt.s32.totalorder %s1322_s26, %s1322_s26 }
  0x3d   :  { %p1152_p13 = scmp.ne.s32.totalorder %s1322_s26, %s1151_s20  ;;  %p1157_p1 = scmp.lt.s32.totalorder %s1151_s20, %s1151_s20 }
  0x3f   :  { %p1158_p2 = por %p1157_p1, %p1156_p0 }
  0x41   :  { %p1159_p3 = pnand %p1158_p2, %p1152_p13 }
  0x43   :  { %1162 = shalt.err (!%p1159_p3)
}
  0x44   :  { %62 = dma.hbm_to_vmem [thread:$0]  %s1555_s3, 256, %s1322_s26, [#allocation9], %s1241_s9, %s1241_s9, %s1242_s10  }
  0x45   :  { %1229 = dma.done.wait [#allocation3], 4096  }
  0x46   :  { %1230 = vsyncadd [#allocation3], 4294963200 }
  0x47   :  { %1231 = dma.done.wait [#allocation6], 384  }
  0x48   :  { %1232 = vsyncadd [#allocation6], 4294966912 }
  0x49   :  { %1233 = dma.done.wait [#allocation9], 256  }
  0x4a   :  { %1234 = vsyncadd [#allocation9], 4294967040  ;;  %v124_v0 = vld [vmem:[#allocation5] sm:$0xff]  ;;  %v125_v1 = vld [vmem:[#allocation5 + $0x8] sm:$0xff]  ;;  %vm127_vm0 = vcmask 130048   ;;  %vm465_vm1 = vcmask 125952  }
  0x4b   :  { %v76_v2 = vld [vmem:[#allocation2] sm:$0xff]  ;;  %v126_v3 = vpack.c.bf16 %v125_v1, %v124_v0  ;;  %v77_v4 = vld [vmem:[#allocation2 + $0x8] sm:$0xff]  ;;  %v78_v5 = vld [vmem:[#allocation2 + $0x10] sm:$0xff]  ;;  %s1245_s3 = smov [#allocation10]  }
  0x4c   :  { %v79_v6 = vld [vmem:[#allocation2 + $0x18] sm:$0xff]  ;;  %v108_v7 = vpack.c.bf16 %v77_v4, %v76_v2  ;;  %v80_v8 = vld [vmem:[#allocation2 + $0x20] sm:$0xff]  ;;  %v81_v9 = vld [vmem:[#allocation2 + $0x28] sm:$0xff]  ;;  %s796_s21 = sshll.u32 %s1245_s3, 4  ;;  %s797_s21 = int_to_ptr.vmem [resolvable:$true] %s796_s21 }
  0x4d   :  { %988 = vmatprep.subr.bf16.mxu1 %v126_v3  ;;  %v109_v10 = vpack.c.bf16 %v79_v6, %v78_v5  ;;  %v110_v11 = vpack.c.bf16 %v81_v9, %v80_v8  ;;  %v82_v12 = vld [vmem:[#allocation2 + $0x30] sm:$0xff]  ;;  %v83_v13 = vld [vmem:[#allocation2 + $0x38] sm:$0xff]  ;;  %v84_v14 = vld [vmem:[#allocation2 + $0x40] sm:$0xff]  ;;  %s1163_s22 = scalar_lea.vmem %s797_s21, 2048  ;;  %p1168_p5 = scmp.lt.s32.totalorder %s797_s21, %s797_s21 }
  0x4e   :  { %989 = vmatpush3.bf16.msra.mxu1 %v126_v3  ;;  %990 = vmatprep.mubr.msk.bf16.mxu1 %vm127_vm0, %v108_v7  ;;  %v85_v15 = vld [vmem:[#allocation2 + $0x48] sm:$0xff]  ;;  %v111_v16 = vpack.c.bf16 %v83_v13, %v82_v12  ;;  %v86_v18 = vld [vmem:[#allocation2 + $0x50] sm:$0xff]  ;;  %v87_v19 = vld [vmem:[#allocation2 + $0x58] sm:$0xff]  ;;  %p1164_p4 = scmp.ne.s32.totalorder %s797_s21, %s1163_s22  ;;  %p1169_p6 = scmp.lt.s32.totalorder %s1163_s22, %s1163_s22 }
  0x4f   :  { %v112_v17 = vpack.c.bf16 %v85_v15, %v84_v14  ;;  %v88_v20 = vld [vmem:[#allocation2 + $0x60] sm:$0xff]  ;;  %v89_v21 = vld [vmem:[#allocation2 + $0x68] sm:$0xff]  ;;  %v113_v22 = vpack.c.bf16 %v87_v19, %v86_v18  ;;  %v90_v24 = vld [vmem:[#allocation2 + $0x70] sm:$0xff] }
  0x50   :  { %v114_v23 = vpack.c.bf16 %v89_v21, %v88_v20  ;;  %v91_v25 = vld [vmem:[#allocation2 + $0x78] sm:$0xff]  ;;  %v92_v26 = vld [vmem:[#allocation2 + $0x80] sm:$0xff]  ;;  %v93_v27 = vld [vmem:[#allocation2 + $0x88] sm:$0xff]  ;;  %p1170_p7 = por %p1169_p6, %p1168_p5 }
  0x51   :  { %991 = vmatmul.mubr.msk.bf16.vlgmr.msra.gmra.mrb[0].mxu1 %vm127_vm0, %v109_v10  ;;  %v115_v28 = vpack.c.bf16 %v91_v25, %v90_v24  ;;  %v116_v29 = vpack.c.bf16 %v93_v27, %v92_v26  ;;  %v94_v30 = vld [vmem:[#allocation2 + $0x90] sm:$0xff]  ;;  %v95_v31 = vld [vmem:[#allocation2 + $0x98] sm:$0xff]  ;;  %v96_v32 = vld [vmem:[#allocation2 + $0xa0] sm:$0xff] }
  0x52   :  { %994 = vmatprep.mubr.msk.bf16.mxu1 %vm127_vm0, %v110_v11  ;;  %v97_v33 = vld [vmem:[#allocation2 + $0xa8] sm:$0xff]  ;;  %v117_v34 = vpack.c.bf16 %v95_v31, %v94_v30  ;;  %v98_v36 = vld [vmem:[#allocation2 + $0xb0] sm:$0xff]  ;;  %v99_v37 = vld [vmem:[#allocation2 + $0xb8] sm:$0xff]  ;;  %p1171_p8 = pnand %p1170_p7, %p1164_p4 }
  0x53   :  { %v118_v35 = vpack.c.bf16 %v97_v33, %v96_v32  ;;  %v100_v38 = vld [vmem:[#allocation2 + $0xc0] sm:$0xff]  ;;  %v101_v39 = vld [vmem:[#allocation2 + $0xc8] sm:$0xff]  ;;  %v119_v40 = vpack.c.bf16 %v99_v37, %v98_v36  ;;  %v102_v42 = vld [vmem:[#allocation2 + $0xd0] sm:$0xff] }
  0x54   :  { %v120_v41 = vpack.c.bf16 %v101_v39, %v100_v38  ;;  %v103_v43 = vld [vmem:[#allocation2 + $0xd8] sm:$0xff]  ;;  %v104_v44 = vld [vmem:[#allocation2 + $0xe0] sm:$0xff]  ;;  %v105_v45 = vld [vmem:[#allocation2 + $0xe8] sm:$0xff] }
  0x55   :  { %v121_v46 = vpack.c.bf16 %v103_v43, %v102_v42  ;;  %v122_v47 = vpack.c.bf16 %v105_v45, %v104_v44  ;;  %v106_v48 = vld [vmem:[#allocation2 + $0xf0] sm:$0xff]  ;;  %v107_v49 = vld [vmem:[#allocation2 + $0xf8] sm:$0xff]  ;;  %v595_v52 = vld [vmem:[#allocation8 + $0x8] sm:$0xff] }
  0x56   :  { %v123_v50 = vpack.c.bf16 %v107_v49, %v106_v48  ;;  %v594_v51 = vld [vmem:[#allocation8] sm:$0xff]  ;;  %v498_v54 = vld [vmem:[#allocation7] sm:$0xff] }
  0x57   :  { %v596_v53 = vpack.c.bf16 %v595_v52, %v594_v51  ;;  %v1372_v55 = vpack.c.bf16 %v498_v54, %v498_v54 }
  0x59   :  { %995 = vmatmul.mubr.msk.bf16.gmra.mrb[4].mxu1 %vm127_vm0, %v111_v16  ;;  %1022 = vmatprep.subr.bf16.mxu0 %v596_v53 }
  0x5a   :  { %998 = vmatprep.mubr.msk.bf16.mxu1 %vm127_vm0, %v112_v17  ;;  %1023 = vmatpush3.bf16.msra.mxu0 %v596_v53 }
  0x61   :  { %999 = vmatmul.mubr.msk.bf16.gmra.mrb[8].mxu1 %vm127_vm0, %v113_v22 }
  0x62   :  { %1002 = vmatprep.mubr.msk.bf16.mxu1 %vm127_vm0, %v114_v23 }
  0x69   :  { %1003 = vmatmul.mubr.msk.bf16.gmra.mrb[12].mxu1 %vm127_vm0, %v115_v28 }
  0x6a   :  { %1006 = vmatprep.mubr.msk.bf16.mxu1 %vm127_vm0, %v116_v29 }
  0x71   :  { %1007 = vmatmul.mubr.msk.bf16.gmra.mrb[16].mxu1 %vm127_vm0, %v117_v34 }
  0x72   :  { %1010 = vmatprep.mubr.msk.bf16.mxu1 %vm127_vm0, %v118_v35 }
  0x79   :  { %1011 = vmatmul.mubr.msk.bf16.gmra.mrb[20].mxu1 %vm127_vm0, %v119_v40 }
  0x7a   :  { %1014 = vmatprep.mubr.msk.bf16.mxu1 %vm127_vm0, %v120_v41 }
  0x81   :  { %1015 = vmatmul.mubr.msk.bf16.gmra.mrb[24].mxu1 %vm127_vm0, %v121_v46 }
  0x82   :  { %1018 = vmatprep.mubr.msk.bf16.mxu1 %vm127_vm0, %v122_v47 }
  0x89   :  { %1019 = vmatmul.mubr.msk.bf16.gmra.mrb[28].mxu1 %vm127_vm0, %v123_v50 }
  0x8a   :  { %969 = vmatprep.mubr.msk.bf16.mxu1 %vm127_vm0, %v1372_v55 }
 0x124   :  { %v992_v56 = vpop.f32.mrb[0].mxu1 }
 0x125   :  { %v906_v57 = vpack.c.bf16 %v992_v56, %v992_v56  ;;  %v210_v58 = vpop.f32.mrb[1].mxu1 }
 0x126   :  { %v904_v59 = vpack.c.bf16 %v210_v58, %v210_v58  ;;  %v993_v60 = vpop.f32.mrb[2].mxu1 }
 0x127   :  { %468 = vst.msk [vmem:[#allocation10 + $0x8] sm:$0xf] %vm465_vm1, %v906_v57  ;;  %v1377_v61 = vpack.c.bf16 %v993_v60, %v992_v56  ;;  %v907_v62 = vpack.c.bf16 %v993_v60, %v993_v60  ;;  %v213_v63 = vpop.f32.mrb[3].mxu1 }
 0x128   :  { %466 = vst.msk [vmem:[#allocation10] sm:$0xf] %vm465_vm1, %v904_v59  ;;  %v905_v0 = vpack.c.bf16 %v213_v63, %v213_v63  ;;  %v1380_v1 = vpack.c.bf16 %v213_v63, %v210_v58 }
 0x129   :  { %469 = vst.msk [vmem:[#allocation10 + $0xc] sm:$0xf] %vm465_vm1, %v907_v62  ;;  %v507_v53 = vsel %vm127_vm0, %v1377_v61, 0 }
 0x12a   :  { %467 = vst.msk [vmem:[#allocation10 + $0x4] sm:$0xf] %vm465_vm1, %v905_v0  ;;  %1024 = vmatprep.mubr.msk.bf16.mxu0 %vm127_vm0, %v1380_v1  ;;  %v504_v42 = vsel %vm127_vm0, %v1380_v1, 0 }
 0x12b   :  { %1025 = vmatmul.mubr.msk.bf16.vlgmr.msra.gmra.mrb[0].mxu0 %vm127_vm0, %v1377_v61 }
 0x12c   :  { %v996_v2 = vpop.f32.mrb[4].mxu1 }
 0x12d   :  { %v910_v3 = vpack.c.bf16 %v996_v2, %v996_v2  ;;  %v226_v4 = vpop.f32.mrb[5].mxu1 }
 0x12e   :  { %v908_v5 = vpack.c.bf16 %v226_v4, %v226_v4  ;;  %v997_v6 = vpop.f32.mrb[6].mxu1 }
 0x12f   :  { %472 = vst.msk [vmem:[#allocation10 + $0x18] sm:$0xf] %vm465_vm1, %v910_v3  ;;  %v1389_v7 = vpack.c.bf16 %v997_v6, %v996_v2  ;;  %v911_v8 = vpack.c.bf16 %v997_v6, %v997_v6  ;;  %v229_v9 = vpop.f32.mrb[7].mxu1 }
 0x130   :  { %470 = vst.msk [vmem:[#allocation10 + $0x10] sm:$0xf] %vm465_vm1, %v908_v5  ;;  %v1392_v10 = vpack.c.bf16 %v229_v9, %v226_v4  ;;  %v909_v11 = vpack.c.bf16 %v229_v9, %v229_v9 }
 0x131   :  { %473 = vst.msk [vmem:[#allocation10 + $0x1c] sm:$0xf] %vm465_vm1, %v911_v8 }
 0x132   :  { %471 = vst.msk [vmem:[#allocation10 + $0x14] sm:$0xf] %vm465_vm1, %v909_v11  ;;  %1028 = vmatprep.mubr.msk.bf16.mxu0 %vm127_vm0, %v1392_v10  ;;  %v510_v1 = vsel %vm127_vm0, %v1392_v10, 0 }
 0x133   :  { %1029 = vmatmul.mubr.msk.bf16.gmra.mrb[4].mxu0 %vm127_vm0, %v1389_v7 }
 0x134   :  { %v1000_v12 = vpop.f32.mrb[8].mxu1 }
 0x135   :  { %v914_v13 = vpack.c.bf16 %v1000_v12, %v1000_v12  ;;  %v242_v14 = vpop.f32.mrb[9].mxu1 }
 0x136   :  { %v912_v15 = vpack.c.bf16 %v242_v14, %v242_v14  ;;  %v1001_v16 = vpop.f32.mrb[10].mxu1 }
 0x137   :  { %476 = vst.msk [vmem:[#allocation10 + $0x28] sm:$0xf] %vm465_vm1, %v914_v13  ;;  %v1401_v17 = vpack.c.bf16 %v1001_v16, %v1000_v12  ;;  %v915_v18 = vpack.c.bf16 %v1001_v16, %v1001_v16  ;;  %v245_v19 = vpop.f32.mrb[11].mxu1  ;;  %v513_v13 = vsel %vm127_vm0, %v1389_v7, 0 }
 0x138   :  { %474 = vst.msk [vmem:[#allocation10 + $0x20] sm:$0xf] %vm465_vm1, %v912_v15  ;;  %v1404_v20 = vpack.c.bf16 %v245_v19, %v242_v14  ;;  %v913_v21 = vpack.c.bf16 %v245_v19, %v245_v19 }
 0x139   :  { %477 = vst.msk [vmem:[#allocation10 + $0x2c] sm:$0xf] %vm465_vm1, %v915_v18  ;;  %v519_v15 = vsel %vm127_vm0, %v1401_v17, 0 }
 0x13a   :  { %475 = vst.msk [vmem:[#allocation10 + $0x24] sm:$0xf] %vm465_vm1, %v913_v21  ;;  %1032 = vmatprep.mubr.msk.bf16.mxu0 %vm127_vm0, %v1404_v20  ;;  %v516_v14 = vsel %vm127_vm0, %v1404_v20, 0 }
 0x13b   :  { %1033 = vmatmul.mubr.msk.bf16.gmra.mrb[8].mxu0 %vm127_vm0, %v1401_v17 }
 0x13c   :  { %v1004_v22 = vpop.f32.mrb[12].mxu1 }
 0x13d   :  { %v918_v23 = vpack.c.bf16 %v1004_v22, %v1004_v22  ;;  %v258_v24 = vpop.f32.mrb[13].mxu1 }
 0x13e   :  { %v916_v25 = vpack.c.bf16 %v258_v24, %v258_v24  ;;  %v1005_v26 = vpop.f32.mrb[14].mxu1 }
 0x13f   :  { %480 = vst.msk [vmem:[#allocation10 + $0x38] sm:$0xf] %vm465_vm1, %v918_v23  ;;  %v1413_v27 = vpack.c.bf16 %v1005_v26, %v1004_v22  ;;  %v919_v28 = vpack.c.bf16 %v1005_v26, %v1005_v26  ;;  %v261_v29 = vpop.f32.mrb[15].mxu1 }
 0x140   :  { %478 = vst.msk [vmem:[#allocation10 + $0x30] sm:$0xf] %vm465_vm1, %v916_v25  ;;  %v1416_v30 = vpack.c.bf16 %v261_v29, %v258_v24  ;;  %v917_v31 = vpack.c.bf16 %v261_v29, %v261_v29 }
 0x141   :  { %481 = vst.msk [vmem:[#allocation10 + $0x3c] sm:$0xf] %vm465_vm1, %v919_v28  ;;  %v525_v16 = vsel %vm127_vm0, %v1413_v27, 0 }
 0x142   :  { %479 = vst.msk [vmem:[#allocation10 + $0x34] sm:$0xf] %vm465_vm1, %v917_v31  ;;  %1036 = vmatprep.mubr.msk.bf16.mxu0 %vm127_vm0, %v1416_v30  ;;  %v522_v7 = vsel %vm127_vm0, %v1416_v30, 0 }
 0x143   :  { %1037 = vmatmul.mubr.msk.bf16.gmra.mrb[12].mxu0 %vm127_vm0, %v1413_v27 }
 0x144   :  { %v1008_v32 = vpop.f32.mrb[16].mxu1 }
 0x145   :  { %v922_v33 = vpack.c.bf16 %v1008_v32, %v1008_v32  ;;  %v274_v34 = vpop.f32.mrb[17].mxu1 }
 0x146   :  { %v920_v35 = vpack.c.bf16 %v274_v34, %v274_v34  ;;  %v1009_v36 = vpop.f32.mrb[18].mxu1 }
 0x147   :  { %484 = vst.msk [vmem:[#allocation10 + $0x48] sm:$0xf] %vm465_vm1, %v922_v33  ;;  %v346_v37 = vpack.c.bf16 %v1009_v36, %v1008_v32  ;;  %v923_v38 = vpack.c.bf16 %v1009_v36, %v1009_v36  ;;  %v277_v39 = vpop.f32.mrb[19].mxu1 }
 0x148   :  { %482 = vst.msk [vmem:[#allocation10 + $0x40] sm:$0xf] %vm465_vm1, %v920_v35  ;;  %v345_v40 = vpack.c.bf16 %v277_v39, %v274_v34  ;;  %v921_v41 = vpack.c.bf16 %v277_v39, %v277_v39 }
 0x149   :  { %485 = vst.msk [vmem:[#allocation10 + $0x4c] sm:$0xf] %vm465_vm1, %v923_v38 }
 0x14a   :  { %483 = vst.msk [vmem:[#allocation10 + $0x44] sm:$0xf] %vm465_vm1, %v921_v41  ;;  %1056 = vmatprep.subr.msk.bf16.mxu1 %vm127_vm0, %v345_v40  ;;  %1040 = vmatprep.mubr.msk.bf16.mxu0 %vm127_vm0, %v345_v40 }
 0x14b   :  { %954 = vmatpush3.bf16.xpose.msra.mxu1 %v504_v42  ;;  %1041 = vmatmul.mubr.msk.bf16.gmra.mrb[16].mxu0 %vm127_vm0, %v346_v37 }
 0x14c   :  { %1057 = vmatprep.subr.msk.bf16.mxu1 %vm127_vm0, %v346_v37  ;;  %v1012_v43 = vpop.f32.mrb[20].mxu1 }
 0x14d   :  { %v926_v44 = vpack.c.bf16 %v1012_v43, %v1012_v43  ;;  %v290_v45 = vpop.f32.mrb[21].mxu1 }
 0x14e   :  { %v924_v46 = vpack.c.bf16 %v290_v45, %v290_v45  ;;  %v1013_v47 = vpop.f32.mrb[22].mxu1 }
 0x14f   :  { %488 = vst.msk [vmem:[#allocation10 + $0x58] sm:$0xf] %vm465_vm1, %v926_v44  ;;  %v348_v48 = vpack.c.bf16 %v1013_v47, %v1012_v43  ;;  %v927_v49 = vpack.c.bf16 %v1013_v47, %v1013_v47  ;;  %v293_v50 = vpop.f32.mrb[23].mxu1 }
 0x150   :  { %486 = vst.msk [vmem:[#allocation10 + $0x50] sm:$0xf] %vm465_vm1, %v924_v46  ;;  %v347_v51 = vpack.c.bf16 %v293_v50, %v290_v45  ;;  %v925_v52 = vpack.c.bf16 %v293_v50, %v293_v50 }
 0x151   :  { %489 = vst.msk [vmem:[#allocation10 + $0x5c] sm:$0xf] %vm465_vm1, %v927_v49 }
 0x152   :  { %487 = vst.msk [vmem:[#allocation10 + $0x54] sm:$0xf] %vm465_vm1, %v925_v52  ;;  %1044 = vmatprep.mubr.msk.bf16.mxu0 %vm127_vm0, %v347_v51 }
 0x153   :  { %956 = vmatpush3.bf16.xpose.msra.mxu1 %v507_v53  ;;  %1045 = vmatmul.mubr.msk.bf16.gmra.mrb[20].mxu0 %vm127_vm0, %v348_v48 }
 0x154   :  { %1058 = vmatprep.subr.msk.bf16.mxu1 %vm127_vm0, %v347_v51  ;;  %v1016_v54 = vpop.f32.mrb[24].mxu1 }
 0x155   :  { %v930_v56 = vpack.c.bf16 %v1016_v54, %v1016_v54  ;;  %v306_v57 = vpop.f32.mrb[25].mxu1 }
 0x156   :  { %v928_v58 = vpack.c.bf16 %v306_v57, %v306_v57  ;;  %v1017_v59 = vpop.f32.mrb[26].mxu1 }
 0x157   :  { %492 = vst.msk [vmem:[#allocation10 + $0x68] sm:$0xf] %vm465_vm1, %v930_v56  ;;  %v350_v60 = vpack.c.bf16 %v1017_v59, %v1016_v54  ;;  %v931_v62 = vpack.c.bf16 %v1017_v59, %v1017_v59  ;;  %v309_v63 = vpop.f32.mrb[27].mxu1 }
 0x158   :  { %490 = vst.msk [vmem:[#allocation10 + $0x60] sm:$0xf] %vm465_vm1, %v928_v58  ;;  %v349_v61 = vpack.c.bf16 %v309_v63, %v306_v57  ;;  %v929_v0 = vpack.c.bf16 %v309_v63, %v309_v63 }
 0x159   :  { %493 = vst.msk [vmem:[#allocation10 + $0x6c] sm:$0xf] %vm465_vm1, %v931_v62 }
 0x15a   :  { %491 = vst.msk [vmem:[#allocation10 + $0x64] sm:$0xf] %vm465_vm1, %v929_v0  ;;  %1048 = vmatprep.mubr.msk.bf16.mxu0 %vm127_vm0, %v349_v61 }
 0x15b   :  { %958 = vmatpush3.bf16.xpose.msra.mxu1 %v510_v1  ;;  %1049 = vmatmul.mubr.msk.bf16.gmra.mrb[24].mxu0 %vm127_vm0, %v350_v60 }
 0x15c   :  { %1059 = vmatprep.subr.msk.bf16.mxu1 %vm127_vm0, %v348_v48  ;;  %v1020_v2 = vpop.f32.mrb[28].mxu1 }
 0x15d   :  { %v934_v3 = vpack.c.bf16 %v1020_v2, %v1020_v2  ;;  %v322_v4 = vpop.f32.mrb[29].mxu1 }
 0x15e   :  { %v932_v5 = vpack.c.bf16 %v322_v4, %v322_v4  ;;  %v1021_v6 = vpop.f32.mrb[30].mxu1 }
 0x15f   :  { %496 = vst.msk [vmem:[#allocation10 + $0x78] sm:$0xf] %vm465_vm1, %v934_v3  ;;  %v352_v8 = vpack.c.bf16 %v1021_v6, %v1020_v2  ;;  %v935_v9 = vpack.c.bf16 %v1021_v6, %v1021_v6  ;;  %v325_v11 = vpop.f32.mrb[31].mxu1 }
 0x160   :  { %494 = vst.msk [vmem:[#allocation10 + $0x70] sm:$0xf] %vm465_vm1, %v932_v5  ;;  %v351_v10 = vpack.c.bf16 %v325_v11, %v322_v4  ;;  %v933_v12 = vpack.c.bf16 %v325_v11, %v325_v11 }
 0x161   :  { %497 = vst.msk [vmem:[#allocation10 + $0x7c] sm:$0xf] %vm465_vm1, %v935_v9 }
 0x162   :  { %495 = vst.msk [vmem:[#allocation10 + $0x74] sm:$0xf] %vm465_vm1, %v933_v12  ;;  %1052 = vmatprep.mubr.msk.bf16.mxu0 %vm127_vm0, %v351_v10 }
 0x163   :  { %960 = vmatpush3.bf16.xpose.msra.mxu1 %v513_v13  ;;  %1053 = vmatmul.mubr.msk.bf16.gmra.mrb[28].mxu0 %vm127_vm0, %v352_v8 }
 0x164   :  { %1060 = vmatprep.subr.msk.bf16.mxu1 %vm127_vm0, %v349_v61 }
 0x16b   :  { %962 = vmatpush3.bf16.xpose.msra.mxu1 %v516_v14 }
 0x16c   :  { %1061 = vmatprep.subr.msk.bf16.mxu1 %vm127_vm0, %v350_v60 }
 0x173   :  { %964 = vmatpush3.bf16.xpose.msra.mxu1 %v519_v15 }
 0x174   :  { %1062 = vmatprep.subr.msk.bf16.mxu1 %vm127_vm0, %v351_v10 }
 0x17b   :  { %966 = vmatpush3.bf16.xpose.msra.mxu1 %v522_v7 }
 0x17c   :  { %1063 = vmatprep.subr.msk.bf16.mxu1 %vm127_vm0, %v352_v8 }
 0x183   :  { %968 = vmatpush3.bf16.xpose.msra.mxu1 %v525_v16 }
 0x18a   :  { %970 = vmatmul.mubr.msk.bf16.vlgmr.msra.gmra.mrb[32].mxu1 %vm127_vm0, %v1372_v55 }
 0x18b   :  { %1174 = shalt.err (!%p1171_p8)
}
 0x18c   :  { %s1175_s26 = scalar_lea.hbm %s1556_s4, 2048 }
 0x18d   :  { %p1176_p9 = scmp.ne.s32.totalorder %s1556_s4, %s1175_s26  ;;  %p1179_p10 = scmp.lt.u32.totalorder %s1175_s26, %s1556_s4 }
 0x18f   :  { %p1181_p11 = pnand %p1179_p10, %p1176_p9 }
 0x191   :  { %1184 = shalt.err (!%p1181_p11)
}
 0x192   :  { %s1246_s7 = smov 64   ;;  %s1247_s8 = smov 4   ;;  %vm758_vm2 = vcmask 64512  }
 0x193   :  { %802 = dma.vmem_to_hbm [thread:$0]  %s797_s21, 2048, %s1556_s4, [#allocation4], %s1246_s7, %s1246_s7, %s1247_s8  }
 0x194   :  { %s1248_s4 = smov [#allocation11]   ;;  %s1249_s12 = smov [#allocation13]  }
 0x195   :  { %s809_s24 = sshll.u32 %s1248_s4, 4  ;;  %s818_s13 = sshll.u32 %s1249_s12, 4  ;;  %s810_s24 = int_to_ptr.vmem [resolvable:$true] %s809_s24  ;;  %s1518_s13 = int_to_ptr.vmem [resolvable:$true] %s818_s13 }
 0x196   :  { %s1185_s14 = scalar_lea.vmem %s810_s24, 256  ;;  %p1190_p13 = scmp.lt.s32.totalorder %s810_s24, %s810_s24 }
 0x197   :  { %p1186_p12 = scmp.ne.s32.totalorder %s810_s24, %s1185_s14  ;;  %p1191_p0 = scmp.lt.s32.totalorder %s1185_s14, %s1185_s14 }
 0x199   :  { %p1192_p1 = por %p1191_p0, %p1190_p13 }
 0x19b   :  { %p1193_p2 = pnand %p1192_p1, %p1186_p12 }
 0x1fe   :  { %v1026_v55 = vpop.f32.mrb[0].mxu0 }
 0x1ff   :  { %761 = vst.msk [vmem:[#allocation13 + $0x10] sm:$0xff] %vm758_vm2, %v1026_v55  ;;  %v631_v17 = vpop.f32.mrb[1].mxu0 }
 0x200   :  { %759 = vst.msk [vmem:[#allocation13] sm:$0xff] %vm758_vm2, %v631_v17  ;;  %v1027_v18 = vpop.f32.mrb[2].mxu0 }
 0x201   :  { %762 = vst.msk [vmem:[#allocation13 + $0x18] sm:$0xff] %vm758_vm2, %v1027_v18  ;;  %v634_v19 = vpop.f32.mrb[3].mxu0 }
 0x202   :  { %760 = vst.msk [vmem:[#allocation13 + $0x8] sm:$0xff] %vm758_vm2, %v634_v19 }
 0x206   :  { %v1030_v20 = vpop.f32.mrb[4].mxu0 }
 0x207   :  { %765 = vst.msk [vmem:[#allocation13 + $0x30] sm:$0xff] %vm758_vm2, %v1030_v20  ;;  %v647_v21 = vpop.f32.mrb[5].mxu0 }
 0x208   :  { %763 = vst.msk [vmem:[#allocation13 + $0x20] sm:$0xff] %vm758_vm2, %v647_v21  ;;  %v1031_v22 = vpop.f32.mrb[6].mxu0 }
 0x209   :  { %766 = vst.msk [vmem:[#allocation13 + $0x38] sm:$0xff] %vm758_vm2, %v1031_v22  ;;  %v650_v23 = vpop.f32.mrb[7].mxu0 }
 0x20a   :  { %764 = vst.msk [vmem:[#allocation13 + $0x28] sm:$0xff] %vm758_vm2, %v650_v23 }
 0x20e   :  { %v1034_v24 = vpop.f32.mrb[8].mxu0 }
 0x20f   :  { %769 = vst.msk [vmem:[#allocation13 + $0x50] sm:$0xff] %vm758_vm2, %v1034_v24  ;;  %v663_v25 = vpop.f32.mrb[9].mxu0 }
 0x210   :  { %767 = vst.msk [vmem:[#allocation13 + $0x40] sm:$0xff] %vm758_vm2, %v663_v25  ;;  %v1035_v26 = vpop.f32.mrb[10].mxu0 }
 0x211   :  { %770 = vst.msk [vmem:[#allocation13 + $0x58] sm:$0xff] %vm758_vm2, %v1035_v26  ;;  %v666_v27 = vpop.f32.mrb[11].mxu0 }
 0x212   :  { %768 = vst.msk [vmem:[#allocation13 + $0x48] sm:$0xff] %vm758_vm2, %v666_v27 }
 0x216   :  { %v1038_v28 = vpop.f32.mrb[12].mxu0 }
 0x217   :  { %773 = vst.msk [vmem:[#allocation13 + $0x70] sm:$0xff] %vm758_vm2, %v1038_v28  ;;  %v679_v29 = vpop.f32.mrb[13].mxu0 }
 0x218   :  { %771 = vst.msk [vmem:[#allocation13 + $0x60] sm:$0xff] %vm758_vm2, %v679_v29  ;;  %v1039_v30 = vpop.f32.mrb[14].mxu0 }
 0x219   :  { %774 = vst.msk [vmem:[#allocation13 + $0x78] sm:$0xff] %vm758_vm2, %v1039_v30  ;;  %v682_v31 = vpop.f32.mrb[15].mxu0 }
 0x21a   :  { %772 = vst.msk [vmem:[#allocation13 + $0x68] sm:$0xff] %vm758_vm2, %v682_v31 }
 0x21e   :  { %v1042_v32 = vpop.f32.mrb[16].mxu0 }
 0x21f   :  { %777 = vst.msk [vmem:[#allocation13 + $0x90] sm:$0xff] %vm758_vm2, %v1042_v32  ;;  %v695_v33 = vpop.f32.mrb[17].mxu0 }
 0x220   :  { %775 = vst.msk [vmem:[#allocation13 + $0x80] sm:$0xff] %vm758_vm2, %v695_v33  ;;  %v1043_v34 = vpop.f32.mrb[18].mxu0 }
 0x221   :  { %778 = vst.msk [vmem:[#allocation13 + $0x98] sm:$0xff] %vm758_vm2, %v1043_v34  ;;  %v698_v35 = vpop.f32.mrb[19].mxu0 }
 0x222   :  { %776 = vst.msk [vmem:[#allocation13 + $0x88] sm:$0xff] %vm758_vm2, %v698_v35 }
 0x226   :  { %v1046_v36 = vpop.f32.mrb[20].mxu0 }
 0x227   :  { %781 = vst.msk [vmem:[#allocation13 + $0xb0] sm:$0xff] %vm758_vm2, %v1046_v36  ;;  %v711_v37 = vpop.f32.mrb[21].mxu0 }
 0x228   :  { %779 = vst.msk [vmem:[#allocation13 + $0xa0] sm:$0xff] %vm758_vm2, %v711_v37  ;;  %v1047_v38 = vpop.f32.mrb[22].mxu0 }
 0x229   :  { %782 = vst.msk [vmem:[#allocation13 + $0xb8] sm:$0xff] %vm758_vm2, %v1047_v38  ;;  %v714_v39 = vpop.f32.mrb[23].mxu0 }
 0x22a   :  { %780 = vst.msk [vmem:[#allocation13 + $0xa8] sm:$0xff] %vm758_vm2, %v714_v39 }
 0x22e   :  { %v1050_v40 = vpop.f32.mrb[24].mxu0 }
 0x22f   :  { %785 = vst.msk [vmem:[#allocation13 + $0xd0] sm:$0xff] %vm758_vm2, %v1050_v40  ;;  %v727_v41 = vpop.f32.mrb[25].mxu0 }
 0x230   :  { %783 = vst.msk [vmem:[#allocation13 + $0xc0] sm:$0xff] %vm758_vm2, %v727_v41  ;;  %v1051_v42 = vpop.f32.mrb[26].mxu0 }
 0x231   :  { %786 = vst.msk [vmem:[#allocation13 + $0xd8] sm:$0xff] %vm758_vm2, %v1051_v42  ;;  %v730_v43 = vpop.f32.mrb[27].mxu0 }
 0x232   :  { %784 = vst.msk [vmem:[#allocation13 + $0xc8] sm:$0xff] %vm758_vm2, %v730_v43 }
 0x236   :  { %v1054_v44 = vpop.f32.mrb[28].mxu0 }
 0x237   :  { %789 = vst.msk [vmem:[#allocation13 + $0xf0] sm:$0xff] %vm758_vm2, %v1054_v44  ;;  %v743_v45 = vpop.f32.mrb[29].mxu0 }
 0x238   :  { %787 = vst.msk [vmem:[#allocation13 + $0xe0] sm:$0xff] %vm758_vm2, %v743_v45  ;;  %v1055_v46 = vpop.f32.mrb[30].mxu0 }
 0x239   :  { %790 = vst.msk [vmem:[#allocation13 + $0xf8] sm:$0xff] %vm758_vm2, %v1055_v46  ;;  %v746_v47 = vpop.f32.mrb[31].mxu0 }
 0x23a   :  { %788 = vst.msk [vmem:[#allocation13 + $0xe8] sm:$0xff] %vm758_vm2, %v746_v47 }
 0x25d   :  { %v585_v48 = vpop.f32.mrb[32].mxu1 }
 0x25e   :  { %592 = vst [vmem:[#allocation11] sm:$0xff] %v585_v48  ;;  %v587_v49 = vpop.f32.mrb[33].mxu1 }
 0x25f   :  { %593 = vst [vmem:[#allocation11 + $0x8] sm:$0xff] %v587_v49  ;;  %v589_v50 = vpop.f32.mrb[34].mxu1 }
 0x260   :  { %v590_v51 = vpop.f32.mrb[35].mxu1 }
 0x261   :  { %1196 = shalt.err (!%p1193_p2)
}
 0x262   :  { %s1197_s17 = scalar_lea.hbm %s1557_s5, 256 }
 0x263   :  { %p1198_p3 = scmp.ne.s32.totalorder %s1557_s5, %s1197_s17  ;;  %p1201_p4 = scmp.lt.u32.totalorder %s1197_s17, %s1557_s5 }
 0x265   :  { %p1203_p5 = pnand %p1201_p4, %p1198_p3 }
 0x267   :  { %1206 = shalt.err (!%p1203_p5)
}
 0x268   :  { %812 = dma.vmem_to_hbm [thread:$0]  %s810_s24, 256, %s1557_s5, [#allocation12]  }
 0x269   :  { %s1207_s21 = scalar_lea.vmem %s1518_s13, 4096  ;;  %p1212_p7 = scmp.lt.s32.totalorder %s1518_s13, %s1518_s13 }
 0x26a   :  { %p1208_p6 = scmp.ne.s32.totalorder %s1518_s13, %s1207_s21  ;;  %p1213_p8 = scmp.lt.s32.totalorder %s1207_s21, %s1207_s21 }
 0x26c   :  { %p1214_p9 = por %p1213_p8, %p1212_p7 }
 0x26e   :  { %p1215_p10 = pnand %p1214_p9, %p1208_p6 }
 0x270   :  { %1218 = shalt.err (!%p1215_p10)
}
 0x271   :  { %s1219_s25 = scalar_lea.hbm %s1558_s6, 4096 }
 0x272   :  { %p1220_p11 = scmp.ne.s32.totalorder %s1558_s6, %s1219_s25  ;;  %p1223_p12 = scmp.lt.u32.totalorder %s1219_s25, %s1558_s6 }
 0x274   :  { %p1225_p13 = pnand %p1223_p12, %p1220_p11 }
 0x276   :  { %1228 = shalt.err (!%p1225_p13)
}
 0x277   :  { %824 = dma.vmem_to_hbm [thread:$0]  %s1518_s13, 4096, %s1558_s6, [#allocation12], %s1241_s9, %s1241_s9, %s1242_s10  }
 0x278   :  { %1235 = dma.done.wait [#allocation4], 2048  }
 0x279   :  { %1236 = vsyncadd [#allocation4], 4294965248 }
 0x27a   :  { %1237 = dma.done.wait [#allocation12], 4352  }
 0x27b   :  { %1238 = vsyncadd [#allocation12], 4294962944 }
 0x27c   :  { %834 = vsyncpa [#allocation3], 1 }
 0x27d   :  { %835 = vsyncpa [#allocation6], 1 }
 0x27e   :  { %836 = vsyncpa [#allocation9], 1 }
 0x27f   :  { %837 = vsyncpa [#allocation4], 1 }
 0x280   :  { %838 = vsyncpa [#allocation12], 1 }

</bundles_post_ra>
